<compile_context>
chip_gen: v6e
topology: v6e:2x2x1
jax: 0.10.0
libtpu: 0.0.40
codegen_flags: <defaults>
</compile_context>

<pallas_src>
import math

import jax
import jax.numpy as jnp
from jax.experimental import pallas as pl
from jax.experimental.pallas import tpu as pltpu

LANE = 128
SUBLANE = 8


def _round_up(x, m):
    return (x + m - 1) // m * m


# --------------------------------------------------------------------------
# Kernel: whole MLP + tanh on one batch tile, weights VMEM-resident.
# --------------------------------------------------------------------------
def _cde_mlp_kernel(h_ref, w1_ref, wr_ref, b_ref, out_ref):
    """h_ref:(TB,HP) f32, w1_ref:(HP,F), wr_ref:(L-1,F,F), b_ref:(L,F) f32,
    out_ref:(TB,F) f32|bf16."""
    n_rest = wr_ref.shape[0]                               # layers 2..L
    wdt = w1_ref.dtype

    # Layer 1: narrow contraction over the true h_dims (padded only to 8 rows).
    x = h_ref[...]                                         # f32 activations
    y = jnp.dot(x.astype(wdt), w1_ref[...],
                preferred_element_type=jnp.float32)        # MXU, f32 accumulate
    x = jnp.maximum(y + b_ref[0:1, :], 0.0)                # bias + ReLU in f32

    # Hidden layers (unrolled at trace time).
    for k in range(n_rest - 1):
        y = jnp.dot(x.astype(wdt), wr_ref[k],
                    preferred_element_type=jnp.float32)
        x = jnp.maximum(y + b_ref[k + 1:k + 2, :], 0.0)

    # Final layer + tanh.
    y = jnp.dot(x.astype(wdt), wr_ref[n_rest - 1],
                preferred_element_type=jnp.float32)
    out_ref[...] = jnp.tanh(y + b_ref[n_rest:n_rest + 1, :]).astype(out_ref.dtype)


# --------------------------------------------------------------------------
# Parameter construction / packing
# --------------------------------------------------------------------------
def init_params(key, x_dims, h_dims, n_units):
    """PyTorch-Linear-style init (uniform +/- 1/sqrt(fan_in)) at TRUE shapes."""
    dims = [(h_dims, n_units), (n_units, n_units),
            (n_units, n_units), (n_units, h_dims * x_dims)]
    ws, bs = [], []
    for fan_in, fan_out in dims:
        key, kw, kb = jax.random.split(key, 3)
        bound = 1.0 / math.sqrt(fan_in)
        ws.append(jax.random.uniform(kw, (fan_in, fan_out), jnp.float32, -bound, bound))
        bs.append(jax.random.uniform(kb, (fan_out,), jnp.float32, -bound, bound))
    return ws, bs


def pack_params(ws, bs, matmul_dtype=jnp.bfloat16):
    """Pad/pack weights for the kernel.

    Returns (W1, W_rest, B):
      W1:     (HP, F)        first-layer weight, rows padded to a sublane multiple
      W_rest: (L-1, F, F)    remaining layers, zero-padded to (F, F)
      B:      (L, F) f32     biases (stay f32: v5e-safe elementwise)
    Zero padding is exact: padded rows/cols contribute nothing, ReLU/tanh(0)=0.
    """
    assert len(ws) >= 2
    F = _round_up(max(max(w.shape[1] for w in ws), max(w.shape[0] for w in ws[1:])), LANE)
    HP = _round_up(ws[0].shape[0], SUBLANE)
    L = len(ws)

    W1 = jnp.zeros((HP, F), jnp.float32).at[:ws[0].shape[0], :ws[0].shape[1]].set(ws[0])
    Wr = jnp.zeros((L - 1, F, F), jnp.float32)
    B = jnp.zeros((L, F), jnp.float32)
    B = B.at[0, :bs[0].shape[0]].set(bs[0])
    for k in range(1, L):
        Wr = Wr.at[k - 1, :ws[k].shape[0], :ws[k].shape[1]].set(ws[k])
        B = B.at[k, :bs[k].shape[0]].set(bs[k])
    return W1.astype(matmul_dtype), Wr.astype(matmul_dtype), B


# --------------------------------------------------------------------------
# Batch-tile selection: minimize padded rows, keep >= 2 grid steps for the
# dual-TensorCore v7x when the batch allows, cap the tile at 1024 rows.
# --------------------------------------------------------------------------
def _choose_batch_tile(B_in, cap=1024):
    n_tiles = max(pl.cdiv(B_in, cap), 1)
    if B_in >= 2 * SUBLANE:
        n_tiles = max(n_tiles, 2)          # both v7x TCs busy; free on v5e/v6e
    TB = _round_up(pl.cdiv(B_in, n_tiles), SUBLANE)
    Bp = _round_up(B_in, TB)
    return TB, Bp


# --------------------------------------------------------------------------
# Forward wrapper
# --------------------------------------------------------------------------
def cde_func_forward(h, packed_params, *, h_dims, x_dims, out_dtype=jnp.float32):
    """h: (..., h_dims) -> (..., h_dims, x_dims)."""
    W1, Wr, Bvec = packed_params           # (HP,F), (L-1,F,F), (L,F)
    HP, F = W1.shape
    out_feats = h_dims * x_dims

    lead = h.shape[:-1]
    h2 = h.reshape(-1, h_dims).astype(jnp.float32)
    B_in = h2.shape[0]

    TB, Bp = _choose_batch_tile(B_in)

    # Only pad when needed (batch rows to a TB multiple, features to HP).
    if Bp == B_in and HP == h_dims:
        h_in = h2
    else:
        h_in = jnp.zeros((Bp, HP), jnp.float32).at[:B_in, :h_dims].set(h2)

    flat = pl.pallas_call(
        _cde_mlp_kernel,
        out_shape=jax.ShapeDtypeStruct((Bp, F), out_dtype),
        grid=(Bp // TB,),
        in_specs=[
            pl.BlockSpec((TB, HP), lambda i: (i, 0)),       # batch-tiled activations
            pl.BlockSpec((HP, F), lambda i: (0, 0)),        # layer-1 weight: resident
            pl.BlockSpec(Wr.shape, lambda i: (0, 0, 0)),    # other weights: resident
            pl.BlockSpec(Bvec.shape, lambda i: (0, 0)),     # biases: resident
        ],
        out_specs=pl.BlockSpec((TB, F), lambda i: (i, 0)),  # lane-dense (F=128) output
        compiler_params=pltpu.CompilerParams(
            dimension_semantics=("parallel",)),             # megacore / dual-TC
    )(h_in, W1, Wr, Bvec)

    # TODO(synk): fuse this slice/reshape (and the cdeint dX/dt matvec consumer)
    # into the kernel so only (B, h_dims) ever hits HBM.
    out = flat[:B_in, :out_feats]
    return out.reshape(*lead, h_dims, x_dims)


# --------------------------------------------------------------------------
# Pure-JAX reference
# --------------------------------------------------------------------------
def reference_forward(h, ws, bs, x_dims, matmul_dtype=jnp.float32):
    x = h
    for i, (w, b) in enumerate(zip(ws, bs)):
        x = jnp.dot(x.astype(matmul_dtype), w.astype(matmul_dtype),
                    preferred_element_type=jnp.float32) + b
        if i < len(ws) - 1:
            x = jnp.maximum(x, 0.0)
    lead, h_dims = h.shape[:-1], h.shape[-1]
    return jnp.tanh(x).reshape(*lead, h_dims, x_dims)


if __name__ == "__main__":
    # CDEFuncParams defaults: h_dims = 2*x_dims, h_trans_dims=100, h_trans_layers=2
    x_dims = 4
    h_dims = 2 * x_dims          # 8
    n_units = 100                # h_trans_dims
    batch = 8

    key = jax.random.PRNGKey(0)
    key, kh, kh2 = jax.random.split(key, 3)
    h = jax.random.normal(kh, (batch, h_dims), dtype=jnp.float32)
    ws, bs = init_params(key, x_dims, h_dims, n_units)

    # 1) f32 operand path — exact semantics of the PyTorch module.
    packed_f32 = pack_params(ws, bs, matmul_dtype=jnp.float32)
    hs = jax.block_until_ready(
        cde_func_forward(h, packed_f32, h_dims=h_dims, x_dims=x_dims))
    hs_ref = reference_forward(h, ws, bs, x_dims)
    assert hs.shape == (batch, h_dims, x_dims), hs.shape
    assert jnp.allclose(hs, hs_ref, atol=2e-5, rtol=2e-5), \
        float(jnp.max(jnp.abs(hs - hs_ref)))

    # 2) bf16-MXU path (the default / fast path on v5e, v6e and v7x):
    #    bf16 operands, f32 accumulation, f32 elementwise. Compared against a
    #    matching mixed-precision reference.
    packed_bf16 = pack_params(ws, bs)                       # default bf16
    hs_bf16 = jax.block_until_ready(
        cde_func_forward(h, packed_bf16, h_dims=h_dims, x_dims=x_dims))
    hs_ref_bf16 = reference_forward(h, ws, bs, x_dims, matmul_dtype=jnp.bfloat16)
    assert jnp.allclose(hs_bf16, hs_ref_bf16, atol=2e-3, rtol=2e-3), \
        float(jnp.max(jnp.abs(hs_bf16 - hs_ref_bf16)))

    # 3) bf16 output option (halves output HBM traffic; tanh range is [-1,1]).
    hs_bf16_out = jax.block_until_ready(
        cde_func_forward(h, packed_bf16, h_dims=h_dims, x_dims=x_dims,
                         out_dtype=jnp.bfloat16))
    assert hs_bf16_out.dtype == jnp.bfloat16
    assert jnp.allclose(hs_bf16_out.astype(jnp.float32), hs_ref_bf16,
                        atol=1e-2, rtol=1e-2), \
        float(jnp.max(jnp.abs(hs_bf16_out.astype(jnp.float32) - hs_ref_bf16)))

    # 4) Odd batch — exercises multi-tile grid + padded-row slicing (B=37 ->
    #    TB=24, Bp=48, grid=(2,), both v7x cores active).
    h_big = jax.random.normal(kh2, (37, h_dims), dtype=jnp.float32)
    hs_big = jax.block_until_ready(
        cde_func_forward(h_big, packed_f32, h_dims=h_dims, x_dims=x_dims))
    hs_big_ref = reference_forward(h_big, ws, bs, x_dims)
    assert hs_big.shape == (37, h_dims, x_dims)
    assert jnp.allclose(hs_big, hs_big_ref, atol=2e-5, rtol=2e-5), \
        float(jnp.max(jnp.abs(hs_big - hs_big_ref)))

    print("KERNEL_OK")
</pallas_src>

<mosaic_0001>
module attributes {stable_mosaic.version = 11 : i64} {
  func.func @_cde_mlp_kernel(%arg0: i32, %arg1: memref<8x8xf32, #tpu.memory_space<vmem>>, %arg2: memref<8x128xf32, #tpu.memory_space<vmem>>, %arg3: memref<3x128x128xf32, #tpu.memory_space<vmem>>, %arg4: memref<4x128xf32, #tpu.memory_space<vmem>>, %arg5: memref<8x128xf32, #tpu.memory_space<vmem>>) attributes {dimension_semantics = [#tpu.dimension_semantics<parallel>], iteration_bounds = array<i64: 1>, scalar_prefetch = 0 : i64, scratch_operands = 0 : i64, tpu.core_type = #tpu.core_type<tc>, window_params = [{transform_indices = @transform_0, window_bounds = array<i64: 8, 8>}, {pipeline_mode = #tpu.pipeline_mode<synchronous>, transform_indices = @transform_1, window_bounds = array<i64: 8, 128>}, {pipeline_mode = #tpu.pipeline_mode<synchronous>, transform_indices = @transform_2, window_bounds = array<i64: 3, 128, 128>}, {pipeline_mode = #tpu.pipeline_mode<synchronous>, transform_indices = @transform_3, window_bounds = array<i64: 4, 128>}, {transform_indices = @transform_4, window_bounds = array<i64: 8, 128>}]} {
    %c0 = arith.constant 0 : index
    %c0_0 = arith.constant 0 : index
    %0 = vector.load %arg1[%c0, %c0_0] : memref<8x8xf32, #tpu.memory_space<vmem>>, vector<8x8xf32>
    %c0_1 = arith.constant 0 : index
    %c0_2 = arith.constant 0 : index
    %1 = vector.load %arg2[%c0_1, %c0_2] : memref<8x128xf32, #tpu.memory_space<vmem>>, vector<8x128xf32>
    %cst = arith.constant dense<0.000000e+00> : vector<8x128xf32>
    %2 = tpu.matmul %0, %1, %cst {dimension_numbers = #tpu.dot_dimension_numbers<[1], [0], [0], [1], [0, 0, 1, 1], [], []>} : vector<8x8xf32>, vector<8x128xf32>, vector<8x128xf32> -> vector<8x128xf32>
    %c0_3 = arith.constant 0 : index
    %c0_4 = arith.constant 0 : index
    %3 = vector.load %arg4[%c0_3, %c0_4] : memref<4x128xf32, #tpu.memory_space<vmem>>, vector<1x128xf32>
    %4 = vector.broadcast %3 : vector<1x128xf32> to vector<8x128xf32>
    %5 = arith.addf %2, %4 : vector<8x128xf32>
    %cst_5 = arith.constant 0.000000e+00 : f32
    %6 = vector.broadcast %cst_5 : f32 to vector<8x128xf32>
    %7 = arith.maximumf %5, %6 : vector<8x128xf32>
    %c0_6 = arith.constant 0 : index
    %c0_7 = arith.constant 0 : index
    %c0_8 = arith.constant 0 : index
    %8 = vector.load %arg3[%c0_6, %c0_7, %c0_8] : memref<3x128x128xf32, #tpu.memory_space<vmem>>, vector<1x128x128xf32>
    %9 = vector.shape_cast %8 : vector<1x128x128xf32> to vector<128x128xf32>
    %cst_9 = arith.constant dense<0.000000e+00> : vector<8x128xf32>
    %10 = tpu.matmul %7, %9, %cst_9 {dimension_numbers = #tpu.dot_dimension_numbers<[1], [0], [0], [1], [0, 0, 1, 1], [], []>} : vector<8x128xf32>, vector<128x128xf32>, vector<8x128xf32> -> vector<8x128xf32>
    %c1 = arith.constant 1 : index
    %c0_10 = arith.constant 0 : index
    %11 = vector.load %arg4[%c1, %c0_10] : memref<4x128xf32, #tpu.memory_space<vmem>>, vector<1x128xf32>
    %12 = vector.broadcast %11 : vector<1x128xf32> to vector<8x128xf32>
    %13 = arith.addf %10, %12 : vector<8x128xf32>
    %cst_11 = arith.constant 0.000000e+00 : f32
    %14 = vector.broadcast %cst_11 : f32 to vector<8x128xf32>
    %15 = arith.maximumf %13, %14 : vector<8x128xf32>
    %c1_12 = arith.constant 1 : index
    %c0_13 = arith.constant 0 : index
    %c0_14 = arith.constant 0 : index
    %16 = vector.load %arg3[%c1_12, %c0_13, %c0_14] : memref<3x128x128xf32, #tpu.memory_space<vmem>>, vector<1x128x128xf32>
    %17 = vector.shape_cast %16 : vector<1x128x128xf32> to vector<128x128xf32>
    %cst_15 = arith.constant dense<0.000000e+00> : vector<8x128xf32>
    %18 = tpu.matmul %15, %17, %cst_15 {dimension_numbers = #tpu.dot_dimension_numbers<[1], [0], [0], [1], [0, 0, 1, 1], [], []>} : vector<8x128xf32>, vector<128x128xf32>, vector<8x128xf32> -> vector<8x128xf32>
    %c2 = arith.constant 2 : index
    %c0_16 = arith.constant 0 : index
    %19 = vector.load %arg4[%c2, %c0_16] : memref<4x128xf32, #tpu.memory_space<vmem>>, vector<1x128xf32>
    %20 = vector.broadcast %19 : vector<1x128xf32> to vector<8x128xf32>
    %21 = arith.addf %18, %20 : vector<8x128xf32>
    %cst_17 = arith.constant 0.000000e+00 : f32
    %22 = vector.broadcast %cst_17 : f32 to vector<8x128xf32>
    %23 = arith.maximumf %21, %22 : vector<8x128xf32>
    %c2_18 = arith.constant 2 : index
    %c0_19 = arith.constant 0 : index
    %c0_20 = arith.constant 0 : index
    %24 = vector.load %arg3[%c2_18, %c0_19, %c0_20] : memref<3x128x128xf32, #tpu.memory_space<vmem>>, vector<1x128x128xf32>
    %25 = vector.shape_cast %24 : vector<1x128x128xf32> to vector<128x128xf32>
    %cst_21 = arith.constant dense<0.000000e+00> : vector<8x128xf32>
    %26 = tpu.matmul %23, %25, %cst_21 {dimension_numbers = #tpu.dot_dimension_numbers<[1], [0], [0], [1], [0, 0, 1, 1], [], []>} : vector<8x128xf32>, vector<128x128xf32>, vector<8x128xf32> -> vector<8x128xf32>
    %c3 = arith.constant 3 : index
    %c0_22 = arith.constant 0 : index
    %27 = vector.load %arg4[%c3, %c0_22] : memref<4x128xf32, #tpu.memory_space<vmem>>, vector<1x128xf32>
    %28 = vector.broadcast %27 : vector<1x128xf32> to vector<8x128xf32>
    %29 = arith.addf %26, %28 : vector<8x128xf32>
    %30 = math.tanh %29 : vector<8x128xf32>
    %c0_23 = arith.constant 0 : index
    %c0_24 = arith.constant 0 : index
    %31 = vector.load %arg5[%c0_23, %c0_24] : memref<8x128xf32, #tpu.memory_space<vmem>>, vector<8x128xf32>
    tpu.vector_store %arg5[%c0_23, %c0_24], %30 {strides = array<i32>} : memref<8x128xf32, #tpu.memory_space<vmem>>, vector<8x128xf32>,
    return
  }
  func.func @transform_0(%arg0: i32) -> (i32, i32) {
    %c0_i32 = arith.constant 0 : i32
    %c0_i32_0 = arith.constant 0 : i32
    return %arg0, %c0_i32 : i32, i32
  }
  func.func @transform_1(%arg0: i32) -> (i32, i32) {
    %c0_i32 = arith.constant 0 : i32
    %c0_i32_0 = arith.constant 0 : i32
    %c0_i32_1 = arith.constant 0 : i32
    return %c0_i32, %c0_i32_0 : i32, i32
  }
  func.func @transform_2(%arg0: i32) -> (i32, i32, i32) {
    %c0_i32 = arith.constant 0 : i32
    %c0_i32_0 = arith.constant 0 : i32
    %c0_i32_1 = arith.constant 0 : i32
    %c0_i32_2 = arith.constant 0 : i32
    return %c0_i32, %c0_i32_0, %c0_i32_1 : i32, i32, i32
  }
  func.func @transform_3(%arg0: i32) -> (i32, i32) {
    %c0_i32 = arith.constant 0 : i32
    %c0_i32_0 = arith.constant 0 : i32
    %c0_i32_1 = arith.constant 0 : i32
    return %c0_i32, %c0_i32_0 : i32, i32
  }
  func.func @transform_4(%arg0: i32) -> (i32, i32) {
    %c0_i32 = arith.constant 0 : i32
    %c0_i32_0 = arith.constant 0 : i32
    return %arg0, %c0_i32 : i32, i32
  }
}

</mosaic_0001>

<bundles_post_ra>
// kernel: tpu_custom_call.1
= control target key start
LH: loop header
LB: loop body
LE: loop exit
PB: predicated region body
PF: predicated region fallthrough
CT: control target
= control target key end

     0   :  { %9 = vsyncpa [#allocation3], 0  ;;  %s810_s0 = inlined_call_operand.hbm [shape: f32[8,8], index: 0, kind: input, shape index: {}]   ;;  %s811_s1 = inlined_call_operand.hbm [shape: f32[8,128], index: 1, kind: input, shape index: {}]   ;;  %s812_s2 = inlined_call_operand.hbm [shape: f32[3,128,128], index: 2, kind: input, shape index: {}]   ;;  %s813_s3 = inlined_call_operand.vmem [shape: f32[4,128], index: 3, kind: input, shape index: {}]   ;;  %s814_s4 = inlined_call_operand.hbm [shape: f32[8,128], index: 4, kind: output, shape index: {}]  }
   0x1   :  { %10 = vsyncpa [#allocation6], 0 }
   0x2   :  { %11 = vsyncpa [#allocation4], 0  ;;  %s696_s15 = smov [#allocation5]   ;;  %s697_s17 = smov [#allocation2]  }
   0x3   :  { %s28_s16 = sshll.u32 %s696_s15, 4  ;;  %s18_s18 = sshll.u32 %s697_s17, 4  ;;  %s29_s16 = int_to_ptr.vmem [resolvable:$true] %s28_s16  ;;  %s19_s18 = int_to_ptr.vmem [resolvable:$true] %s18_s18 }
   0x4   :  { %s618_s19 = scalar_lea.vmem %s29_s16, 128  ;;  %p623_p1 = scmp.lt.s32.totalorder %s29_s16, %s29_s16 }
   0x5   :  { %p619_p0 = scmp.ne.s32.totalorder %s29_s16, %s618_s19  ;;  %p624_p2 = scmp.lt.s32.totalorder %s618_s19, %s618_s19 }
   0x7   :  { %p625_p3 = por %p624_p2, %p623_p1 }
   0x9   :  { %p626_p4 = pnand %p625_p3, %p619_p0 }
   0xb   :  { %629 = shalt.err (!%p626_p4)
}
   0xc   :  { %31 = dma.hbm_to_vmem [thread:$0]  %s811_s1, 128, %s29_s16, [#allocation6]  }
   0xd   :  { %s638_s22 = scalar_lea.vmem %s19_s18, 128  ;;  %p643_p6 = scmp.lt.s32.totalorder %s19_s18, %s19_s18 }
   0xe   :  { %p639_p5 = scmp.ne.s32.totalorder %s19_s18, %s638_s22  ;;  %p644_p7 = scmp.lt.s32.totalorder %s638_s22, %s638_s22 }
  0x10   :  { %p645_p8 = por %p644_p7, %p643_p6 }
  0x12   :  { %p646_p9 = pnand %p645_p8, %p639_p5 }
  0x14   :  { %649 = shalt.err (!%p646_p9)
}
  0x15   :  { %21 = dma.hbm_to_vmem [thread:$0]  %s810_s0, 128, %s19_s18, [#allocation3]  }
  0x16   :  { %s698_s25 = smov [#allocation7]  }
  0x17   :  { %s37_s26 = sshll.u32 %s698_s25, 4  ;;  %s38_s26 = int_to_ptr.vmem [resolvable:$true] %s37_s26 }
  0x18   :  { %s658_s27 = scalar_lea.vmem %s38_s26, 6144  ;;  %p663_p11 = scmp.lt.s32.totalorder %s38_s26, %s38_s26 }
  0x19   :  { %p659_p10 = scmp.ne.s32.totalorder %s38_s26, %s658_s27  ;;  %p664_p12 = scmp.lt.s32.totalorder %s658_s27, %s658_s27 }
  0x1b   :  { %p665_p13 = por %p664_p12, %p663_p11 }
  0x1d   :  { %p666_p0 = pnand %p665_p13, %p659_p10 }
  0x1f   :  { %669 = shalt.err (!%p666_p0)
}
  0x20   :  { %s699_s1 = smov 128   ;;  %s700_s28 = smov 8  }
  0x21   :  { %43 = dma.hbm_to_vmem [thread:$0]  %s812_s2, 6144, %s38_s26, [#allocation6], %s699_s1, %s699_s1, %s700_s28  }
  0x22   :  { %690 = dma.done.wait [#allocation3], 128  }
  0x23   :  { %691 = vsyncadd [#allocation3], 4294967168 }
  0x24   :  { %692 = dma.done.wait [#allocation6], 6272  }
  0x25   :  { %693 = vsyncadd [#allocation6], 4294961024  ;;  %v701_v0 = vmov 0.0   ;;  %vm702_vm0 = vmmov 0   ;;  %vm62_vm1 = vcmask 64512   ;;  %v56_v1 = vld [vmem:[#allocation5] sm:$0xff] }
  0x26   :  { %490 = vmatprep.subr.mxu0 %v701_v0  ;;  %492 = vmatprep.mubr.msk.f32.mxu0 %vm702_vm0, %v701_v0  ;;  %v55_v2 = vld [vmem:[#allocation2] sm:$0xff]  ;;  %v152_v3 = vld [vmem:[#allocation7 + $0x78] sm:$0xff]  ;;  %v150_v5 = vld [vmem:[#allocation7 + $0x68] sm:$0xff]  ;;  %s703_s11 = smov [#allocation8]  }
  0x27   :  { %495 = vmatprep.subr.mxu1 %v701_v0  ;;  %527 = vmatprep.mubr.msk.f32.mxu1 %vm702_vm0, %v701_v0  ;;  %v151_v4 = vld [vmem:[#allocation7 + $0x70] sm:$0xff]  ;;  %v149_v6 = vld [vmem:[#allocation7 + $0x60] sm:$0xff]  ;;  %v148_v7 = vld [vmem:[#allocation7 + $0x58] sm:$0xff]  ;;  %s422_s12 = sshll.u32 %s703_s11, 4  ;;  %s423_s12 = int_to_ptr.vmem [resolvable:$true] %s422_s12 }
  0x28   :  { %491 = vmatpush3.msra.mxu0 %v56_v1  ;;  %496 = vmatpush3.msra.mxu1 %v152_v3  ;;  %v147_v8 = vld [vmem:[#allocation7 + $0x50] sm:$0xff]  ;;  %v146_v9 = vld [vmem:[#allocation7 + $0x48] sm:$0xff]  ;;  %v145_v10 = vld [vmem:[#allocation7 + $0x40] sm:$0xff]  ;;  %s670_s13 = scalar_lea.vmem %s423_s12, 128  ;;  %p675_p2 = scmp.lt.s32.totalorder %s423_s12, %s423_s12 }
  0x29   :  { %493 = vmatmul.mubr.msk.f32.vlgmr.msra.gmra.mxu0 %vm62_vm1, %v55_v2  ;;  %497 = vmatprep.subr.mxu1 %v701_v0  ;;  %v144_v11 = vld [vmem:[#allocation7 + $0x38] sm:$0xff]  ;;  %v143_v12 = vld [vmem:[#allocation7 + $0x30] sm:$0xff]  ;;  %v142_v13 = vld [vmem:[#allocation7 + $0x28] sm:$0xff]  ;;  %p671_p1 = scmp.ne.s32.totalorder %s423_s12, %s670_s13  ;;  %p676_p3 = scmp.lt.s32.totalorder %s670_s13, %s670_s13 }
  0x2a   :  { %498 = vmatpush3.msra.mxu1 %v151_v4  ;;  %530 = vmatprep.subr.mxu0 %v701_v0  ;;  %v141_v14 = vld [vmem:[#allocation7 + $0x20] sm:$0xff]  ;;  %v140_v15 = vld [vmem:[#allocation7 + $0x18] sm:$0xff]  ;;  %v139_v16 = vld [vmem:[#allocation7 + $0x10] sm:$0xff] }
  0x2b   :  { %499 = vmatprep.subr.mxu1 %v701_v0  ;;  %562 = vmatprep.mubr.msk.f32.mxu0 %vm702_vm0, %v701_v0  ;;  %v138_v17 = vld [vmem:[#allocation7 + $0x8] sm:$0xff]  ;;  %v137_v18 = vld [vmem:[#allocation7] sm:$0xff]  ;;  %v245_v19 = vld [vmem:[#allocation7 + $0xf8] sm:$0xff]  ;;  %p677_p4 = por %p676_p3, %p675_p2 }
  0x2c   :  { %500 = vmatpush3.msra.mxu1 %v150_v5  ;;  %v244_v20 = vld [vmem:[#allocation7 + $0xf0] sm:$0xff]  ;;  %531 = vmatpush3.msra.mxu0 %v245_v19  ;;  %v243_v21 = vld [vmem:[#allocation7 + $0xe8] sm:$0xff]  ;;  %v242_v22 = vld [vmem:[#allocation7 + $0xe0] sm:$0xff] }
  0x2d   :  { %501 = vmatprep.subr.mxu1 %v701_v0  ;;  %532 = vmatprep.subr.mxu0 %v701_v0  ;;  %v241_v23 = vld [vmem:[#allocation7 + $0xd8] sm:$0xff]  ;;  %v240_v24 = vld [vmem:[#allocation7 + $0xd0] sm:$0xff]  ;;  %v239_v25 = vld [vmem:[#allocation7 + $0xc8] sm:$0xff]  ;;  %p678_p5 = pnand %p677_p4, %p671_p1 }
  0x2e   :  { %502 = vmatpush3.msra.mxu1 %v149_v6  ;;  %533 = vmatpush3.msra.mxu0 %v244_v20  ;;  %v238_v26 = vld [vmem:[#allocation7 + $0xc0] sm:$0xff]  ;;  %v237_v27 = vld [vmem:[#allocation7 + $0xb8] sm:$0xff]  ;;  %v236_v28 = vld [vmem:[#allocation7 + $0xb0] sm:$0xff] }
  0x2f   :  { %503 = vmatprep.subr.mxu1 %v701_v0  ;;  %534 = vmatprep.subr.mxu0 %v701_v0  ;;  %v235_v29 = vld [vmem:[#allocation7 + $0xa8] sm:$0xff]  ;;  %v234_v30 = vld [vmem:[#allocation7 + $0xa0] sm:$0xff]  ;;  %v233_v31 = vld [vmem:[#allocation7 + $0x98] sm:$0xff] }
  0x30   :  { %504 = vmatpush3.msra.mxu1 %v148_v7  ;;  %535 = vmatpush3.msra.mxu0 %v243_v21  ;;  %v432_v32 = vld [vmem:[%s813_s3] ss:$0 sm:$0xff]  ;;  %v231_v38 = vld [vmem:[#allocation7 + $0x88] sm:$0xff]  ;;  %v230_v39 = vld [vmem:[#allocation7 + $0x80] sm:$0xff] }
  0x31   :  { %505 = vmatprep.subr.mxu1 %v701_v0  ;;  %536 = vmatprep.subr.mxu0 %v701_v0  ;;  %v232_v37 = vld [vmem:[#allocation7 + $0x90] sm:$0xff]  ;;  %v338_v40 = vld [vmem:[#allocation7 + $0x178] sm:$0xff]  ;;  %v336_v42 = vld [vmem:[#allocation7 + $0x168] sm:$0xff] }
  0x32   :  { %506 = vmatpush3.msra.mxu1 %v147_v8  ;;  %537 = vmatpush3.msra.mxu0 %v242_v22  ;;  %v337_v41 = vld [vmem:[#allocation7 + $0x170] sm:$0xff]  ;;  %v335_v43 = vld [vmem:[#allocation7 + $0x160] sm:$0xff]  ;;  %v334_v44 = vld [vmem:[#allocation7 + $0x158] sm:$0xff] }
  0x33   :  { %507 = vmatprep.subr.mxu1 %v701_v0  ;;  %538 = vmatprep.subr.mxu0 %v701_v0  ;;  %v333_v45 = vld [vmem:[#allocation7 + $0x150] sm:$0xff]  ;;  %v332_v46 = vld [vmem:[#allocation7 + $0x148] sm:$0xff]  ;;  %v331_v47 = vld [vmem:[#allocation7 + $0x140] sm:$0xff] }
  0x34   :  { %508 = vmatpush3.msra.mxu1 %v146_v9  ;;  %539 = vmatpush3.msra.mxu0 %v241_v23  ;;  %v330_v48 = vld [vmem:[#allocation7 + $0x138] sm:$0xff]  ;;  %v329_v49 = vld [vmem:[#allocation7 + $0x130] sm:$0xff]  ;;  %v328_v50 = vld [vmem:[#allocation7 + $0x128] sm:$0xff] }
  0x35   :  { %509 = vmatprep.subr.mxu1 %v701_v0  ;;  %540 = vmatprep.subr.mxu0 %v701_v0  ;;  %v327_v51 = vld [vmem:[#allocation7 + $0x120] sm:$0xff]  ;;  %v326_v52 = vld [vmem:[#allocation7 + $0x118] sm:$0xff]  ;;  %v434_v53 = vld [vmem:[%s813_s3 + $0x1] ss:$0 sm:$0xff] }
  0x36   :  { %510 = vmatpush3.msra.mxu1 %v145_v10  ;;  %541 = vmatpush3.msra.mxu0 %v240_v24  ;;  %v325_v58 = vld [vmem:[#allocation7 + $0x110] sm:$0xff]  ;;  %v324_v59 = vld [vmem:[#allocation7 + $0x108] sm:$0xff]  ;;  %v323_v60 = vld [vmem:[#allocation7 + $0x100] sm:$0xff] }
  0x37   :  { %511 = vmatprep.subr.mxu1 %v701_v0  ;;  %542 = vmatprep.subr.mxu0 %v701_v0  ;;  %v435_v61 = vld [vmem:[%s813_s3 + $0x2] ss:$0 sm:$0xff]  ;;  %v436_v3 = vld [vmem:[%s813_s3 + $0x3] ss:$0 sm:$0xff] }
  0x38   :  { %512 = vmatpush3.msra.mxu1 %v144_v11  ;;  %543 = vmatpush3.msra.mxu0 %v239_v25 }
  0x39   :  { %513 = vmatprep.subr.mxu1 %v701_v0  ;;  %544 = vmatprep.subr.mxu0 %v701_v0 }
  0x3a   :  { %514 = vmatpush3.msra.mxu1 %v143_v12  ;;  %545 = vmatpush3.msra.mxu0 %v238_v26 }
  0x3b   :  { %515 = vmatprep.subr.mxu1 %v701_v0  ;;  %546 = vmatprep.subr.mxu0 %v701_v0 }
  0x3c   :  { %516 = vmatpush3.msra.mxu1 %v142_v13  ;;  %547 = vmatpush3.msra.mxu0 %v237_v27 }
  0x3d   :  { %517 = vmatprep.subr.mxu1 %v701_v0  ;;  %548 = vmatprep.subr.mxu0 %v701_v0 }
  0x3e   :  { %518 = vmatpush3.msra.mxu1 %v141_v14  ;;  %549 = vmatpush3.msra.mxu0 %v236_v28 }
  0x3f   :  { %519 = vmatprep.subr.mxu1 %v701_v0  ;;  %550 = vmatprep.subr.mxu0 %v701_v0 }
  0x40   :  { %520 = vmatpush3.msra.mxu1 %v140_v15  ;;  %551 = vmatpush3.msra.mxu0 %v235_v29 }
  0x41   :  { %521 = vmatprep.subr.mxu1 %v701_v0  ;;  %552 = vmatprep.subr.mxu0 %v701_v0 }
  0x42   :  { %522 = vmatpush3.msra.mxu1 %v139_v16  ;;  %553 = vmatpush3.msra.mxu0 %v234_v30 }
  0x43   :  { %523 = vmatprep.subr.mxu1 %v701_v0  ;;  %554 = vmatprep.subr.mxu0 %v701_v0 }
  0x44   :  { %524 = vmatpush3.msra.mxu1 %v138_v17  ;;  %555 = vmatpush3.msra.mxu0 %v233_v31 }
  0x45   :  { %525 = vmatprep.subr.mxu1 %v701_v0  ;;  %556 = vmatprep.subr.mxu0 %v701_v0 }
  0x46   :  { %526 = vmatpush3.msra.mxu1 %v137_v18  ;;  %557 = vmatpush3.msra.mxu0 %v232_v37 }
  0x47   :  { %565 = vmatprep.subr.mxu1 %v701_v0  ;;  %558 = vmatprep.subr.mxu0 %v701_v0 }
  0x48   :  { %559 = vmatpush3.msra.mxu0 %v231_v38 }
  0x49   :  { %560 = vmatprep.subr.mxu0 %v701_v0 }
  0x4a   :  { %561 = vmatpush3.msra.mxu0 %v230_v39 }
  0xe9   :  { %v132_v33 = vpop.f32.mrf.mxu0 }
  0xea   :  { %v133_v34 = vadd.f32 %v432_v32, %v132_v33 }
  0xeb   :  { %v494_v35 = vpop.f32.mrf.mxu0 }
  0xec   :  { %v136_v36 = vmax.f32 %v133_v34, 0.0 }
  0xee   :  { %528 = vmatmul.mubr.f32.vlgmr.msra.gmra.mxu1 %v136_v36 }
  0xef   :  { %597 = vmatprep.mubr.msk.f32.mxu1 %vm702_vm0, %v701_v0  ;;  %566 = vmatpush3.msra.mxu1 %v338_v40 }
  0xf0   :  { %567 = vmatprep.subr.mxu1 %v701_v0 }
  0xf1   :  { %568 = vmatpush3.msra.mxu1 %v337_v41 }
  0xf2   :  { %569 = vmatprep.subr.mxu1 %v701_v0 }
  0xf3   :  { %570 = vmatpush3.msra.mxu1 %v336_v42 }
  0xf4   :  { %571 = vmatprep.subr.mxu1 %v701_v0 }
  0xf5   :  { %572 = vmatpush3.msra.mxu1 %v335_v43 }
  0xf6   :  { %573 = vmatprep.subr.mxu1 %v701_v0 }
  0xf7   :  { %574 = vmatpush3.msra.mxu1 %v334_v44 }
  0xf8   :  { %575 = vmatprep.subr.mxu1 %v701_v0 }
  0xf9   :  { %576 = vmatpush3.msra.mxu1 %v333_v45 }
  0xfa   :  { %577 = vmatprep.subr.mxu1 %v701_v0 }
  0xfb   :  { %578 = vmatpush3.msra.mxu1 %v332_v46 }
  0xfc   :  { %579 = vmatprep.subr.mxu1 %v701_v0 }
  0xfd   :  { %580 = vmatpush3.msra.mxu1 %v331_v47 }
  0xfe   :  { %581 = vmatprep.subr.mxu1 %v701_v0 }
  0xff   :  { %582 = vmatpush3.msra.mxu1 %v330_v48 }
 0x100   :  { %583 = vmatprep.subr.mxu1 %v701_v0 }
 0x101   :  { %584 = vmatpush3.msra.mxu1 %v329_v49 }
 0x102   :  { %585 = vmatprep.subr.mxu1 %v701_v0 }
 0x103   :  { %586 = vmatpush3.msra.mxu1 %v328_v50 }
 0x104   :  { %587 = vmatprep.subr.mxu1 %v701_v0 }
 0x105   :  { %588 = vmatpush3.msra.mxu1 %v327_v51 }
 0x106   :  { %589 = vmatprep.subr.mxu1 %v701_v0 }
 0x107   :  { %590 = vmatpush3.msra.mxu1 %v326_v52 }
 0x108   :  { %591 = vmatprep.subr.mxu1 %v701_v0 }
 0x109   :  { %592 = vmatpush3.msra.mxu1 %v325_v58 }
 0x10a   :  { %593 = vmatprep.subr.mxu1 %v701_v0 }
 0x10b   :  { %594 = vmatpush3.msra.mxu1 %v324_v59 }
 0x10c   :  { %595 = vmatprep.subr.mxu1 %v701_v0 }
 0x10d   :  { %596 = vmatpush3.msra.mxu1 %v323_v60 }
 0x1ae   :  { %v224_v54 = vpop.f32.mrf.mxu1 }
 0x1af   :  { %v225_v55 = vadd.f32 %v434_v53, %v224_v54 }
 0x1b0   :  { %v529_v56 = vpop.f32.mrf.mxu1 }
 0x1b1   :  { %v228_v57 = vmax.f32 %v225_v55, 0.0 }
 0x1b3   :  { %563 = vmatmul.mubr.f32.vlgmr.msra.gmra.mxu0 %v228_v57 }
 0x273   :  { %v317_v62 = vpop.f32.mrf.mxu0 }
 0x274   :  { %v318_v63 = vadd.f32 %v435_v61, %v317_v62 }
 0x275   :  { %v564_v1 = vpop.f32.mrf.mxu0 }
 0x276   :  { %v321_v2 = vmax.f32 %v318_v63, 0.0 }
 0x278   :  { %598 = vmatmul.mubr.f32.vlgmr.msra.gmra.mxu1 %v321_v2 }
 0x338   :  { %v410_v4 = vpop.f32.mrf.mxu1 }
 0x339   :  { %v411_v5 = vadd.f32 %v436_v3, %v410_v4 }
 0x33a   :  { %v599_v6 = vpop.f32.mrf.mxu1 }
 0x33b   :  { %608 = vtanh.f32 %v411_v5 }
 0x348   :  { %v609_v0 = vpop.eup %608 }
 0x349   :  { %415 = vst [vmem:[#allocation8] sm:$0xff] %v609_v0 }
 0x34a   :  { %681 = shalt.err (!%p678_p5)
}
 0x34b   :  { %425 = dma.vmem_to_hbm [thread:$0]  %s423_s12, 128, %s814_s4, [#allocation4]  }
 0x34c   :  { %694 = dma.done.wait [#allocation4], 128  }
 0x34d   :  { %695 = vsyncadd [#allocation4], 4294967168 }
 0x34e   :  { %429 = vsyncpa [#allocation3], 1 }
 0x34f   :  { %430 = vsyncpa [#allocation6], 1 }
 0x350   :  { %431 = vsyncpa [#allocation4], 1 }

</bundles_post_ra>
